<compile_context>
chip_gen: v5e
topology: v5e:2x2
jax: 0.10.0
libtpu: 0.0.40
codegen_flags: <defaults>
</compile_context>

<pallas_src>
import functools

import jax
import jax.numpy as jnp
from jax.experimental import pallas as pl
from jax.experimental.pallas import tpu as pltpu

HIDDEN_SIZE = 12   # hidden_size from the PyTorch module
SUBLANE = 8        # TPU sublane width (second-to-last dim alignment)


def _round_up(x, m):
    return (x + m - 1) // m * m


def _dqn_fused_kernel(x_ref, w1_ref, b1_ref, w2_ref, b2_ref, q_ref, act_ref):
    """Fused MLP forward + argmax for one batch tile.

    x_ref  : (TB, IN)    f32  input rows at native width (no lane padding)
    w1_ref : (IN, HID)   f32  resident across grid steps
    b1_ref : (1, HID)    f32
    w2_ref : (HID, OUT)  f32
    b2_ref : (1, OUT)    f32
    q_ref  : (TB, OUT)   f32  Q-values (== PyTorch forward)
    act_ref: (1, 1, TB)  i32  lane-dense per-row argmax (== basic_forward)
    """
    # Layer 1 on the MXU (f32 accumulation), bias + ReLU on the VPU.
    h = jnp.dot(x_ref[...], w1_ref[...], preferred_element_type=jnp.float32)
    h = jnp.maximum(h + b1_ref[...], 0.0)

    # Layer 2 on the MXU, bias add.
    o = jnp.dot(h, w2_ref[...], preferred_element_type=jnp.float32)
    o = o + b2_ref[...]
    q_ref[...] = o.astype(q_ref.dtype)

    # Fused argmax over the (unpadded) action lanes, first-max tie-break,
    # stored as a lane-dense int32 row for this tile.
    tb, out = o.shape
    lane = jax.lax.broadcasted_iota(jnp.int32, (tb, out), 1)
    best = jnp.max(o, axis=-1, keepdims=True)
    idx = jnp.where(o == best, lane, out)           # first max -> smallest index
    act_ref[...] = jnp.min(idx, axis=-1).reshape(1, 1, tb)


@functools.partial(jax.jit, static_argnames=("block_b",))
def dqn_forward(x, w1, b1, w2, b2, *, block_b=1024):
    """Fused DQN forward.

    Args:
      x : (B, input_size)          float32
      w1: (input_size, hidden)     float32  (= hidden.weight.T in PyTorch terms)
      b1: (1, hidden) or (hidden,) float32
      w2: (hidden, output)         float32  (= output.weight.T)
      b2: (1, output) or (output,) float32
      block_b: batch tile size (rounded to a multiple of 8); sweep 1024-4096
               for large B, keep >= 2 grid steps so v7x can use both TCs.

    Returns:
      q      : (B, output) float32 Q-values  (== PyTorch forward)
      actions: (B,)        int32 argmax action per row (== basic_forward per state)
    """
    B, in_size = x.shape
    hid = w1.shape[1]
    out_size = w2.shape[1]
    b1 = b1.reshape(1, -1)
    b2 = b2.reshape(1, -1)

    # Batch tile: as large as block_b allows (bigger tiles amortize the ~0.35us
    # per-grid-step pipeline overhead), rounded to the sublane width.
    tb = min(block_b, _round_up(B, SUBLANE))
    tb = max(SUBLANE, _round_up(tb, SUBLANE))
    b_pad = _round_up(B, tb)
    num_tiles = b_pad // tb

    # Only the batch axis is (cheaply) zero-padded when B is not a tile multiple;
    # the feature axis is read at native width — no 128-lane inflation, no cast.
    xp = x if b_pad == B else jnp.pad(x, ((0, b_pad - B), (0, 0)))

    # True (unpadded) cost numbers — advisory for XLA scheduling only.
    flops = 2 * B * (in_size * hid + hid * out_size)
    bytes_accessed = (B * in_size * 4 + in_size * hid * 4 + hid * 4
                      + hid * out_size * 4 + out_size * 4
                      + B * out_size * 4 + b_pad * 4)

    q, act = pl.pallas_call(
        _dqn_fused_kernel,
        out_shape=(
            jax.ShapeDtypeStruct((b_pad, out_size), jnp.float32),
            jax.ShapeDtypeStruct((num_tiles, 1, tb), jnp.int32),
        ),
        grid_spec=pltpu.PrefetchScalarGridSpec(
            num_scalar_prefetch=0,
            grid=(num_tiles,),
            in_specs=[
                pl.BlockSpec((tb, in_size), lambda i: (i, 0)),     # x tile (native width)
                pl.BlockSpec((in_size, hid), lambda i: (0, 0)),    # W1 (resident)
                pl.BlockSpec((1, hid), lambda i: (0, 0)),          # b1 (resident)
                pl.BlockSpec((hid, out_size), lambda i: (0, 0)),   # W2 (resident)
                pl.BlockSpec((1, out_size), lambda i: (0, 0)),     # b2 (resident)
            ],
            out_specs=(
                pl.BlockSpec((tb, out_size), lambda i: (i, 0)),    # Q (narrow writeback)
                pl.BlockSpec((1, 1, tb), lambda i: (i, 0, 0)),     # actions (lane-dense)
            ),
        ),
        compiler_params=pltpu.CompilerParams(
            dimension_semantics=("parallel",),   # v7x: split batch tiles across both TCs
        ),
        cost_estimate=pl.CostEstimate(
            flops=flops, transcendentals=0, bytes_accessed=bytes_accessed),
    )(xp, w1, b1, w2, b2)

    return q[:B], act.reshape(b_pad)[:B]


def init_dqn_params(key, input_size, output_size):
    """Parameter init matching the PyTorch __init__ semantics:
      - hidden.weight ~ U(-0.001, 0.001)
      - output.weight ~ U(-0.1, 0.1)
      - biases keep the nn.Linear default: U(-1/sqrt(fan_in), 1/sqrt(fan_in))
    Weights are stored kernel-ready: f32, already transposed to (in, out), no
    padding/casting needed at call time.
    """
    k1, k2, k3, k4 = jax.random.split(key, 4)
    w1 = jax.random.uniform(k1, (input_size, HIDDEN_SIZE), jnp.float32,
                            minval=-0.001, maxval=0.001)
    bound1 = 1.0 / jnp.sqrt(jnp.float32(input_size))
    b1 = jax.random.uniform(k2, (1, HIDDEN_SIZE), jnp.float32,
                            minval=-bound1, maxval=bound1)
    w2 = jax.random.uniform(k3, (HIDDEN_SIZE, output_size), jnp.float32,
                            minval=-0.1, maxval=0.1)
    bound2 = 1.0 / jnp.sqrt(jnp.float32(HIDDEN_SIZE))
    b2 = jax.random.uniform(k4, (1, output_size), jnp.float32,
                            minval=-bound2, maxval=bound2)
    return w1, b1, w2, b2


def dqn_forward_ref(x, w1, b1, w2, b2):
    """Pure-JAX f32 reference (same math as the PyTorch forward)."""
    h = jnp.maximum(x @ w1 + b1.reshape(1, -1), 0.0)
    return h @ w2 + b2.reshape(1, -1)


# TODO(synk): loss (MSELoss), Adam optimizer step and the epsilon-greedy Python RNG
# from the PyTorch class are training-host logic, not part of the forward pass, and
# are intentionally not translated to Pallas.

if __name__ == "__main__":
    # Small shapes consistent with the module: input_size=16, hidden_size=12 (fixed),
    # output_size=4 actions. Batch of 32 states, block_b=16 -> grid of 2 batch tiles,
    # exercising the batched/pipelined path (and giving v7x an even grid) while tiny.
    batch, input_size, output_size = 32, 16, 4

    key = jax.random.PRNGKey(0)
    kx, kp = jax.random.split(key)
    x = jax.random.normal(kx, (batch, input_size), jnp.float32)
    w1, b1, w2, b2 = init_dqn_params(kp, input_size, output_size)

    q, actions = dqn_forward(x, w1, b1, w2, b2, block_b=16)
    q = jax.block_until_ready(q)
    actions = jax.block_until_ready(actions)

    ref = dqn_forward_ref(x, w1, b1, w2, b2)
    assert q.shape == (batch, output_size)
    assert actions.shape == (batch,)
    # MXU f32 matmul pass decomposition may differ slightly from the XLA reference
    # dot, so keep a modest tolerance.
    assert jnp.allclose(q, ref, atol=1e-2, rtol=1e-2), "Q-value mismatch vs reference"
    # Fused argmax must agree with argmax of the Q-values the kernel itself produced.
    assert jnp.all(actions == jnp.argmax(q, axis=-1)), "fused argmax mismatch"

    print("KERNEL_OK")
</pallas_src>

<mosaic_0001>
module attributes {stable_mosaic.version = 11 : i64} {
  func.func @_dqn_fused_kernel(%arg0: i32, %arg1: memref<16x16xf32, #tpu.memory_space<vmem>>, %arg2: memref<16x12xf32, #tpu.memory_space<vmem>>, %arg3: memref<1x12xf32, #tpu.memory_space<vmem>>, %arg4: memref<12x4xf32, #tpu.memory_space<vmem>>, %arg5: memref<1x4xf32, #tpu.memory_space<vmem>>, %arg6: memref<16x4xf32, #tpu.memory_space<vmem>>, %arg7: memref<1x1x16xi32, #tpu.memory_space<vmem>>) attributes {dimension_semantics = [#tpu.dimension_semantics<parallel>], iteration_bounds = array<i64: 2>, scalar_prefetch = 0 : i64, scratch_operands = 0 : i64, tpu.core_type = #tpu.core_type<tc>, window_params = [{transform_indices = @transform_0, window_bounds = array<i64: 16, 16>}, {pipeline_mode = #tpu.pipeline_mode<synchronous>, transform_indices = @transform_1, window_bounds = array<i64: 16, 12>}, {pipeline_mode = #tpu.pipeline_mode<synchronous>, transform_indices = @transform_2, window_bounds = array<i64: 1, 12>}, {pipeline_mode = #tpu.pipeline_mode<synchronous>, transform_indices = @transform_3, window_bounds = array<i64: 12, 4>}, {pipeline_mode = #tpu.pipeline_mode<synchronous>, transform_indices = @transform_4, window_bounds = array<i64: 1, 4>}, {transform_indices = @transform_5, window_bounds = array<i64: 16, 4>}, {transform_indices = @transform_6, window_bounds = array<i64: 1, 1, 16>}]} {
    %c0 = arith.constant 0 : index
    %c0_0 = arith.constant 0 : index
    %0 = vector.load %arg1[%c0, %c0_0] : memref<16x16xf32, #tpu.memory_space<vmem>>, vector<16x16xf32>
    %c0_1 = arith.constant 0 : index
    %c0_2 = arith.constant 0 : index
    %1 = vector.load %arg2[%c0_1, %c0_2] : memref<16x12xf32, #tpu.memory_space<vmem>>, vector<16x12xf32>
    %cst = arith.constant dense<0.000000e+00> : vector<16x12xf32>
    %2 = tpu.matmul %0, %1, %cst {dimension_numbers = #tpu.dot_dimension_numbers<[1], [0], [0], [1], [0, 0, 1, 1], [], []>} : vector<16x16xf32>, vector<16x12xf32>, vector<16x12xf32> -> vector<16x12xf32>
    %c0_3 = arith.constant 0 : index
    %c0_4 = arith.constant 0 : index
    %3 = vector.load %arg3[%c0_3, %c0_4] : memref<1x12xf32, #tpu.memory_space<vmem>>, vector<1x12xf32>
    %4 = vector.broadcast %3 : vector<1x12xf32> to vector<16x12xf32>
    %5 = arith.addf %2, %4 : vector<16x12xf32>
    %cst_5 = arith.constant 0.000000e+00 : f32
    %6 = vector.broadcast %cst_5 : f32 to vector<16x12xf32>
    %7 = arith.maximumf %5, %6 : vector<16x12xf32>
    %c0_6 = arith.constant 0 : index
    %c0_7 = arith.constant 0 : index
    %8 = vector.load %arg4[%c0_6, %c0_7] : memref<12x4xf32, #tpu.memory_space<vmem>>, vector<12x4xf32>
    %cst_8 = arith.constant dense<0.000000e+00> : vector<16x4xf32>
    %9 = tpu.matmul %7, %8, %cst_8 {dimension_numbers = #tpu.dot_dimension_numbers<[1], [0], [0], [1], [0, 0, 1, 1], [], []>} : vector<16x12xf32>, vector<12x4xf32>, vector<16x4xf32> -> vector<16x4xf32>
    %c0_9 = arith.constant 0 : index
    %c0_10 = arith.constant 0 : index
    %10 = vector.load %arg5[%c0_9, %c0_10] : memref<1x4xf32, #tpu.memory_space<vmem>>, vector<1x4xf32>
    %11 = vector.broadcast %10 : vector<1x4xf32> to vector<16x4xf32>
    %12 = arith.addf %9, %11 : vector<16x4xf32>
    %c0_11 = arith.constant 0 : index
    %c0_12 = arith.constant 0 : index
    %13 = vector.load %arg6[%c0_11, %c0_12] : memref<16x4xf32, #tpu.memory_space<vmem>>, vector<16x4xf32>
    tpu.vector_store %arg6[%c0_11, %c0_12], %12 {strides = array<i32>} : memref<16x4xf32, #tpu.memory_space<vmem>>, vector<16x4xf32>,
    %14 = tpu.iota {dimensions = array<i32: 1>} : vector<16x4xi32>
    %cst_13 = arith.constant dense<0xFF800000> : vector<16xf32>
    %15 = vector.multi_reduction <maximumf>, %12, %cst_13 [1] : vector<16x4xf32> to vector<16xf32>
    %16 = vector.shape_cast %15 : vector<16xf32> to vector<16x1xf32>
    %17 = vector.broadcast %16 : vector<16x1xf32> to vector<16x4xf32>
    %18 = arith.cmpf oeq, %12, %17 : vector<16x4xf32>
    %c4_i32 = arith.constant 4 : i32
    %19 = vector.broadcast %c4_i32 : i32 to vector<16x4xi32>
    %20 = arith.select %18, %14, %19 : vector<16x4xi1>, vector<16x4xi32>
    %cst_14 = arith.constant dense<2147483647> : vector<16xi32>
    %21 = vector.multi_reduction <minsi>, %20, %cst_14 [1] : vector<16x4xi32> to vector<16xi32>
    %22 = vector.shape_cast %21 : vector<16xi32> to vector<1x1x16xi32>
    %c0_15 = arith.constant 0 : index
    %c0_16 = arith.constant 0 : index
    %c0_17 = arith.constant 0 : index
    %23 = vector.load %arg7[%c0_15, %c0_16, %c0_17] : memref<1x1x16xi32, #tpu.memory_space<vmem>>, vector<1x1x16xi32>
    tpu.vector_store %arg7[%c0_15, %c0_16, %c0_17], %22 {strides = array<i32>} : memref<1x1x16xi32, #tpu.memory_space<vmem>>, vector<1x1x16xi32>,
    return
  }
  func.func @transform_0(%arg0: i32) -> (i32, i32) {
    %c0_i32 = arith.constant 0 : i32
    %c0_i32_0 = arith.constant 0 : i32
    return %arg0, %c0_i32 : i32, i32
  }
  func.func @transform_1(%arg0: i32) -> (i32, i32) {
    %c0_i32 = arith.constant 0 : i32
    %c0_i32_0 = arith.constant 0 : i32
    %c0_i32_1 = arith.constant 0 : i32
    return %c0_i32, %c0_i32_0 : i32, i32
  }
  func.func @transform_2(%arg0: i32) -> (i32, i32) {
    %c0_i32 = arith.constant 0 : i32
    %c0_i32_0 = arith.constant 0 : i32
    %c0_i32_1 = arith.constant 0 : i32
    return %c0_i32, %c0_i32_0 : i32, i32
  }
  func.func @transform_3(%arg0: i32) -> (i32, i32) {
    %c0_i32 = arith.constant 0 : i32
    %c0_i32_0 = arith.constant 0 : i32
    %c0_i32_1 = arith.constant 0 : i32
    return %c0_i32, %c0_i32_0 : i32, i32
  }
  func.func @transform_4(%arg0: i32) -> (i32, i32) {
    %c0_i32 = arith.constant 0 : i32
    %c0_i32_0 = arith.constant 0 : i32
    %c0_i32_1 = arith.constant 0 : i32
    return %c0_i32, %c0_i32_0 : i32, i32
  }
  func.func @transform_5(%arg0: i32) -> (i32, i32) {
    %c0_i32 = arith.constant 0 : i32
    %c0_i32_0 = arith.constant 0 : i32
    return %arg0, %c0_i32 : i32, i32
  }
  func.func @transform_6(%arg0: i32) -> (i32, i32, i32) {
    %c0_i32 = arith.constant 0 : i32
    %c0_i32_0 = arith.constant 0 : i32
    %c0_i32_1 = arith.constant 0 : i32
    return %arg0, %c0_i32, %c0_i32_0 : i32, i32, i32
  }
}

</mosaic_0001>

<bundles_post_ra>
// kernel: dqn_forward.1
= control target key start
LH: loop header
LB: loop body
LE: loop exit
PB: predicated region body
PF: predicated region fallthrough
CT: control target
= control target key end

     0   :  { %s550_s21 = smov 0   ;;  %s599_s0 = inlined_call_operand.vmem [shape: f32[32,16], index: 0, kind: input, shape index: {}]   ;;  %s600_s1 = inlined_call_operand.vmem [shape: f32[16,12], index: 1, kind: input, shape index: {}]   ;;  %s601_s2 = inlined_call_operand.vmem [shape: f32[1,12], index: 2, kind: input, shape index: {}]   ;;  %s602_s3 = inlined_call_operand.vmem [shape: f32[12,4], index: 3, kind: input, shape index: {}]   ;;  %s603_s4 = inlined_call_operand.vmem [shape: f32[1,4], index: 4, kind: input, shape index: {}]   ;;  %s604_s5 = inlined_call_operand.vmem [shape: f32[32,4], index: 5, kind: output, shape index: {0}]   ;;  %s605_s6 = inlined_call_operand.vmem [shape: s32[2,1,16], index: 6, kind: output, shape index: {1}]  }
   0x1 LB: > { %s556_s22 = sadd.s32 4294967295, %s513_s21   ;;  %p481_p0 = scmp.ge.s32.totalorder %s513_s21, 1  ;;  %s513_s21 = sphi %s550_s21, %s17_s21  }
   0x2   : > { %p216_p1 = scmp.lt.s32.totalorder %s513_s21, 3 }
   0x4   : > { %p217_p2 = pnand %p481_p0, %p216_p1 }
   0x5   : > { %s482_s27 = sshll.u32 (!%p217_p2), %s556_s22, 1  ;;  %p261_p4 = scmp.lt.s32.totalorder (!%p217_p2), %s556_s22, 1 }
   0x6   : > { %220 = sbr.rel (%p217_p2) target bundleno = 651 (0x28b), region = 40  ;;  %p250_p3 = scmp.lt.s32.totalorder (!%p217_p2), %s482_s27, 3 }
   0xb   : > { %v267_v0 = vld [vmem:[%s600_s1 + $0x8] sm:$0xff]  ;;  %v266_v1 = vld [vmem:[%s600_s1] sm:$0xff]  ;;  %s607_s27 = smov (!%p250_p3, %s482_s27), 3  ;;  %vm272_vm0 = vcmask 130048   ;;  %vm317_vm1 = vcmask 1043456   ;;  %vm310_vm2 = vcmask 97280   ;;  %v347_v20 = vlaneseq }
   0xc   : > { %293 = vmatpush.msra.mxu0 %v267_v0  ;;  %493 = vmatpush.msra.mxu2 %v267_v0  ;;  %s483_s28 = sshll.u32 %s607_s27, 3  ;;  %v305_v4 = vld [vmem:[%s602_s3 + $0x8] sm:$0xf]  ;;  %v304_v5 = vld [vmem:[%s602_s3] sm:$0xff]  ;;  %vm344_vm3 = vcmask 31744   ;;  %s609_s22 = smov (!%p261_p4, %s556_s22), 1 }
   0xd   : > { %s253_s7 = scalar_lea.vmem %s599_s0, %s483_s28  ;;  %488 = vmatpush.msk.msra.mxu1 %vm317_vm1, %v305_v4  ;;  %495 = vmatpush.msk.msra.mxu3 %vm317_vm1, %v305_v4  ;;  %v505_v6 = vld [vmem:[%s601_s2] ss:$0 sm:$0xff]  ;;  %s259_s18 = scalar_lea.vmem %s604_s5, %s483_s28  ;;  %v348_v21 = vand.u32 127, %v347_v20  ;;  %vm392_vm8 = vcmask 130112   ;;  %vm394_vm9 = vcmask 122880  }
   0xe   : > { %294 = vmatpush.msra.mxu0 %v266_v1  ;;  %494 = vmatpush.msra.mxu2 %v266_v1  ;;  %v264_v2 = vld [vmem:[%s253_s7] sm:$0xff]  ;;  %v265_v3 = vld [vmem:[%s253_s7 + $0x8] sm:$0xff]  ;;  %s263_s23 = scalar_lea.vmem %s605_s6, %s609_s22 }
   0xf   : > { %486 = vmatmul.msk.f32.vlgmr.msra.gmra.mxu0 %vm272_vm0, %v264_v2  ;;  %487 = vmatmul.msk.f32.vlgmr.msra.gmra.mxu2 %vm272_vm0, %v265_v3  ;;  %v506_v13 = vld [vmem:[%s603_s4] ss:$0 sm:$0xff]  ;;  %v390_v48 = vadd.s32 4294967288, %v348_v21 }
  0x10   : > { %336 = vmatpush.msra.mxu1 %v304_v5  ;;  %496 = vmatpush.msra.mxu3 %v304_v5 }
  0x8c   : > { %v296_v7 = vpop.f32.mrf.mxu0 }
  0x8d   : > { %v297_v8 = vadd.f32 %v505_v6, %v296_v7 }
  0x8f   : > { %v302_v9 = vmax.f32 %v297_v8, 0.0 }
  0x91   : > { %489 = vmatmul.msk.f32.vlgmr.msra.gmra.mxu1 %vm310_vm2, %v302_v9 }
  0x92   : > { %v299_v10 = vpop.f32.mrf.mxu2 }
  0x93   : > { %v300_v11 = vadd.f32 %v505_v6, %v299_v10 }
  0x95   : > { %v303_v12 = vmax.f32 %v300_v11, 0.0 }
  0x97   : > { %490 = vmatmul.msk.f32.vlgmr.msra.gmra.mxu3 %vm310_vm2, %v303_v12 }
 0x10e   : > { %v338_v14 = vpop.f32.mrf.mxu1 }
 0x10f   : > { %v339_v15 = vadd.f32 %v506_v13, %v338_v14 }
 0x111   : > { %345 = vst.msk [vmem:[%s259_s18] sm:$0xff] %vm344_vm3, %v339_v15  ;;  %v349_v16 = vsel %vm344_vm3, %v339_v15, -inf }
 0x112   : > { %350 = vmax.xlane.f32.xlu0 %v349_v16 }
 0x11a   : > { %v341_v17 = vpop.f32.mrf.mxu3 }
 0x11b   : > { %v342_v18 = vadd.f32 %v506_v13, %v341_v17 }
 0x11d   : > { %346 = vst.msk [vmem:[%s259_s18 + $0x8] sm:$0xff] %vm344_vm3, %v342_v18  ;;  %v352_v19 = vsel %vm344_vm3, %v342_v18, -inf }
 0x11e   : > { %353 = vmax.xlane.f32.xlu0 %v352_v19 }
 0x185   : > { %v351_v22 = vpop.xlane.xlu0 %350 }
 0x186   : > { %vm355_vm4 = vcmp.eq.f32.partialorder %v339_v15, %v351_v22 }
 0x187   : > { %v357_v23 = vsel %vm355_vm4, %v348_v21, 4 }
 0x188   : > { %v359_v24 = vsel %vm344_vm3, %v357_v23, 2147483647 }
 0x189   : > { %v361_v25 = vshra.s32 %v359_v24, 16  ;;  %v360_v32 = vand.u32 65535, %v359_v24 }
 0x18b   : > { %v363_v26 = vcvt.s32.f32 %v361_v25  ;;  %v362_v34 = vcvt.s32.f32 %v360_v32 }
 0x18d   : > { %364 = vmin.xlane.f32.xlu1 %v363_v26 }
 0x191   : > { %v354_v27 = vpop.xlane.xlu0 %353 }
 0x192   : > { %vm356_vm5 = vcmp.eq.f32.partialorder %v342_v18, %v354_v27 }
 0x193   : > { %v358_v28 = vsel %vm356_vm5, %v348_v21, 4 }
 0x194   : > { %v374_v29 = vsel %vm344_vm3, %v358_v28, 2147483647 }
 0x195   : > { %v376_v30 = vshra.s32 %v374_v29, 16  ;;  %v375_v36 = vand.u32 65535, %v374_v29 }
 0x197   : > { %v378_v31 = vcvt.s32.f32 %v376_v30  ;;  %v377_v38 = vcvt.s32.f32 %v375_v36 }
 0x199   : > { %379 = vmin.xlane.f32.xlu1 %v378_v31 }
 0x200   : > { %v365_v33 = vpop.xlane.xlu1 %364 }
 0x201   : > { %vm366_vm6 = vcmp.eq.f32.partialorder %v363_v26, %v365_v33  ;;  %v371_v41 = vcvt.f32.s32 %v365_v33 }
 0x202   : > { %v367_v35 = vsel %vm366_vm6, %v362_v34, inf }
 0x203   : > { %368 = vmin.xlane.f32.xlu2 %v367_v35  ;;  %v372_v44 = vshll.u32 %v371_v41, 16 }
 0x20c   : > { %v380_v37 = vpop.xlane.xlu1 %379 }
 0x20d   : > { %vm381_vm7 = vcmp.eq.f32.partialorder %v378_v31, %v380_v37  ;;  %v386_v42 = vcvt.f32.s32 %v380_v37 }
 0x20e   : > { %v382_v39 = vsel %vm381_vm7, %v377_v38, inf }
 0x20f   : > { %383 = vmin.xlane.f32.xlu2 %v382_v39  ;;  %v387_v46 = vshll.u32 %v386_v42, 16 }
 0x276   : > { %v369_v40 = vpop.xlane.xlu2 %368 }
 0x277   : > { %v370_v43 = vcvt.f32.s32 %v369_v40 }
 0x279   : > { %v373_v47 = vadd.s32 %v372_v44, %v370_v43 }
 0x27b   : > { %v389_v51 = vperm.slane %v373_v47, %v348_v21 }
 0x282   : > { %v384_v45 = vpop.xlane.xlu2 %383 }
 0x283   : > { %v385_v49 = vcvt.f32.s32 %v384_v45 }
 0x285   : > { %v388_v50 = vadd.s32 %v387_v46, %v385_v49 }
 0x287   : > { %v391_v52 = vperm.slane %v388_v50, %v390_v48 }
 0x289   : > { %v393_v53 = vsel %vm392_vm8, %v391_v52, %v389_v51 }
 0x28a   : > { %395 = vst.msk [vmem:[%s263_s23] sm:$0x1] %vm394_vm9, %v393_v53 }
 0x28b PF: > { %s17_s21 = sadd.s32 1, %s513_s21  }
 0x28c   : > { %p14_p5 = scmp.ge.s32.totalorder %s17_s21, 4  }
 0x28e   :  { %16 = sbr.rel (!%p14_p5) target bundleno = 1 (0x1), region = 82 }

</bundles_post_ra>
